<compile_context>
chip_gen: v6e
topology: v6e:2x2x1
jax: 0.10.0
libtpu: 0.0.40
codegen_flags: <defaults>
</compile_context>

<pallas_src>
import numpy as np
import jax
import jax.numpy as jnp
from jax.experimental import pallas as pl
from jax.experimental.pallas import tpu as pltpu

EPS = 1e-5   # nn.LayerNorm default eps


# ------------------------- Pallas kernels ----------------------------------
def _patch_embed_norm_kernel(x_ref, g_ref, b_ref, o_ref):
    # x_ref: (1, C, HW)  ->  o_ref: (1, HW, C)   fused transpose + LayerNorm(C)
    xt = x_ref[0].T                                        # (HW, C) via XLU
    mu = jnp.mean(xt, axis=-1, keepdims=True)
    var = jnp.mean(jnp.square(xt - mu), axis=-1, keepdims=True)
    y = (xt - mu) * jax.lax.rsqrt(var + EPS)
    o_ref[0] = (y * g_ref[0] + b_ref[0]).astype(o_ref.dtype)


def _patch_embed_kernel(x_ref, o_ref):
    # norm_layer=None path: pure flatten(2).transpose(1, 2)
    o_ref[0] = x_ref[0].T.astype(o_ref.dtype)


# ------------------------- wrapper ------------------------------------------
def patch_embed_forward(x, gamma=None, beta=None):
    """PatchEmbed.forward: x (B, C, H, W) -> (B, H*W, C), optional LayerNorm(C)."""
    b, c, h, w = x.shape
    hw = h * w
    xf = x.reshape(b, c, hw)                      # flatten(2): free reshape

    out_shape = jax.ShapeDtypeStruct((b, hw, c), x.dtype)
    x_spec = pl.BlockSpec((1, c, hw), lambda i: (i, 0, 0))
    out_spec = pl.BlockSpec((1, hw, c), lambda i: (i, 0, 0))
    cparams = pltpu.CompilerParams(dimension_semantics=("parallel",))

    if gamma is None:                             # norm_layer=None (module default)
        return pl.pallas_call(
            _patch_embed_kernel,
            out_shape=out_shape,
            grid=(b,),
            in_specs=[x_spec],
            out_specs=out_spec,
            compiler_params=cparams,
        )(xf)

    g = gamma.reshape(1, c).astype(x.dtype)
    bt = beta.reshape(1, c).astype(x.dtype)
    return pl.pallas_call(
        _patch_embed_norm_kernel,
        out_shape=out_shape,
        grid=(b,),
        in_specs=[
            x_spec,
            pl.BlockSpec((1, c), lambda i: (0, 0)),   # gamma: fetched once
            pl.BlockSpec((1, c), lambda i: (0, 0)),   # beta : fetched once
        ],
        out_specs=out_spec,
        compiler_params=cparams,
    )(xf, g, bt)


# ------------------------- pure-JAX reference -------------------------------
def patch_embed_reference(x, gamma=None, beta=None):
    b, c, h, w = x.shape
    y = jnp.transpose(x.reshape(b, c, h * w), (0, 2, 1))    # (B, H*W, C)
    if gamma is not None:
        mu = jnp.mean(y, axis=-1, keepdims=True)
        var = jnp.mean(jnp.square(y - mu), axis=-1, keepdims=True)
        y = (y - mu) * jax.lax.rsqrt(var + EPS) * gamma + beta
    return y


# ------------------------- main ---------------------------------------------
if __name__ == "__main__":
    B, EMBED_DIM, H, W = 2, 96, 16, 16            # embed_dim = module default (96)
    key = jax.random.PRNGKey(0)
    kx, kg, kb = jax.random.split(key, 3)
    x = jax.random.normal(kx, (B, EMBED_DIM, H, W), dtype=jnp.float32)
    gamma = (1.0 + 0.05 * jax.random.normal(kg, (EMBED_DIM,))).astype(jnp.float32)
    beta = (0.05 * jax.random.normal(kb, (EMBED_DIM,))).astype(jnp.float32)

    # Path 1: norm_layer=nn.LayerNorm (as used in SRFormer with patch_norm=True)
    out = jax.block_until_ready(patch_embed_forward(x, gamma, beta))
    ref = patch_embed_reference(x, gamma, beta)
    np.testing.assert_allclose(np.asarray(out), np.asarray(ref),
                               rtol=1e-4, atol=1e-5)
    assert out.shape == (B, H * W, EMBED_DIM)

    # Path 2: norm_layer=None (module default) -- pure flatten + transpose
    out2 = jax.block_until_ready(patch_embed_forward(x))
    ref2 = patch_embed_reference(x)
    np.testing.assert_allclose(np.asarray(out2), np.asarray(ref2),
                               rtol=0.0, atol=0.0)
    assert out2.shape == (B, H * W, EMBED_DIM)

    print("KERNEL_OK")
</pallas_src>

<mosaic_0001>
module attributes {stable_mosaic.version = 11 : i64} {
  func.func @_patch_embed_norm_kernel(%arg0: i32, %arg1: memref<1x96x256xf32, #tpu.memory_space<vmem>>, %arg2: memref<1x96xf32, #tpu.memory_space<vmem>>, %arg3: memref<1x96xf32, #tpu.memory_space<vmem>>, %arg4: memref<1x256x96xf32, #tpu.memory_space<vmem>>) attributes {dimension_semantics = [#tpu.dimension_semantics<parallel>], iteration_bounds = array<i64: 2>, scalar_prefetch = 0 : i64, scratch_operands = 0 : i64, tpu.core_type = #tpu.core_type<tc>, window_params = [{transform_indices = @transform_0, window_bounds = array<i64: 1, 96, 256>}, {pipeline_mode = #tpu.pipeline_mode<synchronous>, transform_indices = @transform_1, window_bounds = array<i64: 1, 96>}, {pipeline_mode = #tpu.pipeline_mode<synchronous>, transform_indices = @transform_2, window_bounds = array<i64: 1, 96>}, {transform_indices = @transform_3, window_bounds = array<i64: 1, 256, 96>}]} {
    %c0 = arith.constant 0 : index
    %c0_0 = arith.constant 0 : index
    %c0_1 = arith.constant 0 : index
    %0 = vector.load %arg1[%c0, %c0_0, %c0_1] : memref<1x96x256xf32, #tpu.memory_space<vmem>>, vector<1x96x256xf32>
    %1 = vector.shape_cast %0 : vector<1x96x256xf32> to vector<96x256xf32>
    %2 = tpu.transpose %1, [1, 0] : vector<96x256xf32> -> vector<256x96xf32>
    %cst = arith.constant dense<0.000000e+00> : vector<256xf32>
    %3 = vector.multi_reduction <add>, %2, %cst [1] : vector<256x96xf32> to vector<256xf32>
    %4 = vector.shape_cast %3 : vector<256xf32> to vector<256x1xf32>
    %cst_2 = arith.constant 9.600000e+01 : f32
    %5 = vector.broadcast %cst_2 : f32 to vector<256x1xf32>
    %6 = arith.divf %4, %5 : vector<256x1xf32>
    %7 = vector.broadcast %6 : vector<256x1xf32> to vector<256x96xf32>
    %8 = arith.subf %2, %7 : vector<256x96xf32>
    %9 = arith.mulf %8, %8 : vector<256x96xf32>
    %cst_3 = arith.constant dense<0.000000e+00> : vector<256xf32>
    %10 = vector.multi_reduction <add>, %9, %cst_3 [1] : vector<256x96xf32> to vector<256xf32>
    %11 = vector.shape_cast %10 : vector<256xf32> to vector<256x1xf32>
    %cst_4 = arith.constant 9.600000e+01 : f32
    %12 = vector.broadcast %cst_4 : f32 to vector<256x1xf32>
    %13 = arith.divf %11, %12 : vector<256x1xf32>
    %14 = vector.broadcast %6 : vector<256x1xf32> to vector<256x96xf32>
    %15 = arith.subf %2, %14 : vector<256x96xf32>
    %cst_5 = arith.constant 9.99999974E-6 : f32
    %16 = vector.broadcast %cst_5 : f32 to vector<256x1xf32>
    %17 = arith.addf %13, %16 : vector<256x1xf32>
    %18 = math.rsqrt %17 : vector<256x1xf32>
    %19 = vector.broadcast %18 : vector<256x1xf32> to vector<256x96xf32>
    %20 = arith.mulf %15, %19 : vector<256x96xf32>
    %c0_6 = arith.constant 0 : index
    %c0_7 = arith.constant 0 : index
    %21 = vector.load %arg2[%c0_6, %c0_7] : memref<1x96xf32, #tpu.memory_space<vmem>>, vector<1x96xf32>
    %22 = vector.shape_cast %21 : vector<1x96xf32> to vector<96xf32>
    %23 = vector.shape_cast %22 : vector<96xf32> to vector<1x96xf32>
    %24 = vector.broadcast %23 : vector<1x96xf32> to vector<256x96xf32>
    %25 = arith.mulf %20, %24 : vector<256x96xf32>
    %c0_8 = arith.constant 0 : index
    %c0_9 = arith.constant 0 : index
    %26 = vector.load %arg3[%c0_8, %c0_9] : memref<1x96xf32, #tpu.memory_space<vmem>>, vector<1x96xf32>
    %27 = vector.shape_cast %26 : vector<1x96xf32> to vector<96xf32>
    %28 = vector.shape_cast %27 : vector<96xf32> to vector<1x96xf32>
    %29 = vector.broadcast %28 : vector<1x96xf32> to vector<256x96xf32>
    %30 = arith.addf %25, %29 : vector<256x96xf32>
    %c0_10 = arith.constant 0 : index
    %c0_11 = arith.constant 0 : index
    %c0_12 = arith.constant 0 : index
    %31 = vector.load %arg4[%c0_10, %c0_11, %c0_12] : memref<1x256x96xf32, #tpu.memory_space<vmem>>, vector<1x256x96xf32>
    %32 = vector.shape_cast %31 : vector<1x256x96xf32> to vector<256x96xf32>
    %33 = vector.shape_cast %30 : vector<256x96xf32> to vector<1x256x96xf32>
    tpu.vector_store %arg4[%c0_10, %c0_11, %c0_12], %33 {strides = array<i32>} : memref<1x256x96xf32, #tpu.memory_space<vmem>>, vector<1x256x96xf32>,
    return
  }
  func.func @transform_0(%arg0: i32) -> (i32, i32, i32) {
    %c0_i32 = arith.constant 0 : i32
    %c0_i32_0 = arith.constant 0 : i32
    %c0_i32_1 = arith.constant 0 : i32
    return %arg0, %c0_i32, %c0_i32_0 : i32, i32, i32
  }
  func.func @transform_1(%arg0: i32) -> (i32, i32) {
    %c0_i32 = arith.constant 0 : i32
    %c0_i32_0 = arith.constant 0 : i32
    %c0_i32_1 = arith.constant 0 : i32
    return %c0_i32, %c0_i32_0 : i32, i32
  }
  func.func @transform_2(%arg0: i32) -> (i32, i32) {
    %c0_i32 = arith.constant 0 : i32
    %c0_i32_0 = arith.constant 0 : i32
    %c0_i32_1 = arith.constant 0 : i32
    return %c0_i32, %c0_i32_0 : i32, i32
  }
  func.func @transform_3(%arg0: i32) -> (i32, i32, i32) {
    %c0_i32 = arith.constant 0 : i32
    %c0_i32_0 = arith.constant 0 : i32
    %c0_i32_1 = arith.constant 0 : i32
    return %arg0, %c0_i32, %c0_i32_0 : i32, i32, i32
  }
}

</mosaic_0001>

<bundles_post_ra>
// kernel: tpu_custom_call.1
= control target key start
LH: loop header
LB: loop body
LE: loop exit
PB: predicated region body
PF: predicated region fallthrough
CT: control target
= control target key end

     0   :  { %8 = vsyncpa [#allocation3], 0  ;;  %s1701_s0 = inlined_call_operand.hbm [shape: f32[2,96,256], index: 0, kind: input, shape index: {}]   ;;  %s1702_s1 = inlined_call_operand.vmem [shape: f32[1,96], index: 1, kind: input, shape index: {}]   ;;  %s1703_s2 = inlined_call_operand.vmem [shape: f32[1,96], index: 2, kind: input, shape index: {}]   ;;  %s1704_s3 = inlined_call_operand.vmem [shape: f32[2,256,96], index: 3, kind: output, shape index: {}]  }
   0x1   :  { %10 = vsyncpa [#allocation3 + $0x1], 0  ;;  %s1082_s12 = smov 0   ;;  %s1084_s13 = smov 0  }
   0x2   :  { %s1086_s14 = smov 0   ;;  %s1088_s15 = smov 0  }
   0x3 LB: > { %s1101_s16 = sadd.s32 4294967295, %s1057_s15   ;;  %s1104_s17 = sadd.s32 1, %s1057_s15   ;;  %s1057_s15 = sphi %s1088_s15, %s1713_s15   ;;  %s1053_s14 = sphi %s1086_s14, %s1712_s14   ;;  %s1049_s13 = sphi %s1084_s13, %s1711_s13   ;;  %s1045_s12 = sphi %s1082_s12, %s1710_s12  }
   0x4   : > { %s20_s18 = ssub.s32 %s1057_s15, %s1104_s17  ;;  %s23_s19 = sadd.s32 1, %s1053_s14 }
   0x5   : > { %p21_p0 = scmp.eq.s32.totalorder %s20_s18, 0  ;;  %p30_p1 = scmp.ne.s32.totalorder %s1053_s14, %s1049_s13 }
   0x6   : > { %p31_p2 = scmp.eq.s32.totalorder %s1057_s15, 0  ;;  %p36_p3 = scmp.ne.s32.totalorder %s1049_s13, %s1045_s12 }
   0x7   : > { %s1114_s20 = scalar_select %p21_p0, %s1053_s14, %s23_s19  }
   0x8   : > { %p32_p4 = por %p31_p2, %p30_p1  ;;  %p37_p5 = scmp.eq.s32.totalorder %s1101_s16, 0 }
   0x9   : > { %p895_p6 = scmp.lt.s32.totalorder %s1057_s15, 2  ;;  %s134_s22 = sand.u32 1, %s1053_s14  }
   0xa   : > { %p1118_p7 = por %p37_p5, %p36_p3  ;;  %s886_s23 = smul.u32 192, %s134_s22 }
   0xb   : > { %s887_s24 = smul.u32 3072, %s1057_s15  ;;  %p1124_p8 = pnand %p895_p6, %p32_p4 }
   0xc   : > { %s1706_s21 = scalar_select %p1118_p7, 1, 0 }
   0xd   : > { %s1131_s28 = scalar_lea.hbm %s1701_s0, %s887_s24  ;;  %s138_s29 = scalar_lea.vmem [#allocation2], %s886_s23 }
   0xe   : > { %s145_s30 = sshll.u32 %s138_s29, 4  ;;  %s1136_s4 = scalar_lea.sflag [#allocation3], %s134_s22  ;;  %s1133_s30 = int_to_ptr.vmem [resolvable:$true] %s145_s30 }
   0xf   : > { %s995_s5 = scalar_lea.hbm %s1131_s28, 3072  ;;  %p997_p11 = pneg %p1124_p8 }
  0x10   : > { %p996_p10 = scmp.ne.s32.totalorder %s1131_s28, %s995_s5  ;;  %s1000_s8 = scalar_lea.hbm %s1701_s0, 6144 }
  0x11   : > { %p1001_p0 = scmp.lt.s32.totalorder %s1131_s28, %s1701_s0  ;;  %p1002_p1 = scmp.lt.s32.totalorder %s1000_s8, %s995_s5 }
  0x12   : > { %p998_p12 = pnand %p997_p11, %p996_p10 }
  0x13   : > { %p1003_p2 = por %p1002_p1, %p1001_p0 }
  0x14   : > { %p999_p13 = pneg %p998_p12 }
  0x16   : > { %p1004_p3 = pnand %p1003_p2, %p999_p13 }
  0x18   : > { %1007 = shalt.err (!%p1004_p3)
}
  0x19   : > { %s1008_s11 = scalar_lea.vmem %s1133_s30, 3072  ;;  %s1059_s12 = smov [#allocation2]  }
  0x1a   : > { %p1009_p4 = scmp.ne.s32.totalorder %s1133_s30, %s1008_s11  ;;  %s1013_s18 = sshll.u32 %s1059_s12, 4  ;;  %s1014_s18 = int_to_ptr.vmem [resolvable:$false] %s1013_s18 }
  0x1b   : > { %s1015_s19 = scalar_lea.vmem %s1014_s18, 6144  ;;  %p1016_p10 = scmp.lt.s32.totalorder %s1133_s30, %s1014_s18 }
  0x1c   : > { %p1011_p5 = pnand %p1009_p4, %p997_p11  ;;  %p1017_p12 = scmp.lt.s32.totalorder %s1015_s19, %s1008_s11 }
  0x1e   : > { %p1012_p6 = pneg %p1011_p5  ;;  %p1018_p9 = por %p1017_p12, %p1016_p10 }
  0x20   : > { %p1019_p7 = pnand %p1018_p9, %p1012_p6 }
  0x22   : > { %1022 = shalt.err (!%p1019_p7)
}
  0x23   : > { %s1060_s22 = smov 256   ;;  %s1061_s23 = smov 16  }
  0x24   : > { %894 = dma.hbm_to_vmem [thread:$0]  (!%p1124_p8), %s1131_s28, 3072, %s1133_s30, %s1136_s4, %s1060_s22, %s1060_s22, %s1061_s23  }
  0x25   : > { %p153_p11 = scmp.lt.s32.totalorder %s1057_s15, 3  ;;  %p1708_p13 = scmp.ge.s32.totalorder %s1057_s15, 1 }
  0x27   : > { %p154_p0 = pnand %p1708_p13, %p153_p11 }
  0x28   : > { %s159_s24 = sand.u32 (!%p154_p0), 1, %s1049_s13   ;;  %p1709_p7 = scmp.ne.s32.totalorder (!%p154_p0), %s1706_s21, 0 }
  0x29   : > { %157 = sbr.rel (%p154_p0) target bundleno = 550 (0x226), region = 32  ;;  %s160_s27 = scalar_lea.sflag (!%p154_p0), [#allocation3], %s159_s24 }
  0x2a   : > { %s888_s26 = smul.u32 (!%p154_p0), 192, %s159_s24 }
  0x2c   : > { %s1161_s29 = scalar_lea.vmem (!%p154_p0), [#allocation2], %s888_s26 }
  0x2e   : > { %1040 = dma.done.wait (%p1709_p7), %s160_s27, 3072  }
  0x2f   : > { %1042 = vsyncadd (%p1709_p7), %s160_s27, 4294964224  ;;  %v192_v0 = vld [vmem:[%s1161_s29 + $0x8] sm:$0xff]  ;;  %v191_v1 = vld [vmem:[%s1161_s29] sm:$0xff]  ;;  %vm279_vm0 = vcmask 785408   ;;  %p186_p8 = scmp.lt.s32.totalorder %s1101_s16, 1 }
  0x30   : > { %247 = vxpose.xlu1.b32.start [1/12] (short) %v192_v0, 128  ;;  %215 = vxpose.xlu0.b32.start [1/12] (short) %v191_v1, 128  ;;  %v194_v2 = vld [vmem:[%s1161_s29 + $0x18] sm:$0xff]  ;;  %v193_v3 = vld [vmem:[%s1161_s29 + $0x10] sm:$0xff]  ;;  %v196_v4 = vld [vmem:[%s1161_s29 + $0x28] sm:$0xff] }
  0x31   : > { %v195_v5 = vld [vmem:[%s1161_s29 + $0x20] sm:$0xff]  ;;  %v198_v6 = vld [vmem:[%s1161_s29 + $0x38] sm:$0xff]  ;;  %v197_v7 = vld [vmem:[%s1161_s29 + $0x30] sm:$0xff]  ;;  %s1715_s16 = smov (!%p186_p8, %s1101_s16), 1 }
  0x32   : > { %v200_v8 = vld [vmem:[%s1161_s29 + $0x48] sm:$0xff]  ;;  %v199_v9 = vld [vmem:[%s1161_s29 + $0x40] sm:$0xff]  ;;  %v202_v10 = vld [vmem:[%s1161_s29 + $0x58] sm:$0xff]  ;;  %s885_s25 = sshll.u32 %s1715_s16, 8 }
  0x33   : > { %v201_v11 = vld [vmem:[%s1161_s29 + $0x50] sm:$0xff]  ;;  %v204_v12 = vld [vmem:[%s1161_s29 + $0x68] sm:$0xff]  ;;  %v203_v13 = vld [vmem:[%s1161_s29 + $0x60] sm:$0xff]  ;;  %s1528_s16 = scalar_lea.vmem %s1704_s3, %s885_s25 }
  0x34   : > { %248 = vxpose.xlu1.b32.cont [2/12] (short) %v194_v2, 128  ;;  %216 = vxpose.xlu0.b32.cont [2/12] (short) %v193_v3, 128  ;;  %v206_v14 = vld [vmem:[%s1161_s29 + $0x78] sm:$0xff]  ;;  %v205_v15 = vld [vmem:[%s1161_s29 + $0x70] sm:$0xff]  ;;  %v208_v16 = vld [vmem:[%s1161_s29 + $0x88] sm:$0xff] }
  0x35   : > { %v207_v17 = vld [vmem:[%s1161_s29 + $0x80] sm:$0xff]  ;;  %v210_v18 = vld [vmem:[%s1161_s29 + $0x98] sm:$0xff]  ;;  %v209_v19 = vld [vmem:[%s1161_s29 + $0x90] sm:$0xff] }
  0x36   : > { %v212_v20 = vld [vmem:[%s1161_s29 + $0xa8] sm:$0xff]  ;;  %v211_v21 = vld [vmem:[%s1161_s29 + $0xa0] sm:$0xff]  ;;  %v214_v22 = vld [vmem:[%s1161_s29 + $0xb8] sm:$0xff] }
  0x37   : > { %v213_v23 = vld [vmem:[%s1161_s29 + $0xb0] sm:$0xff] }
  0x38   : > { %249 = vxpose.xlu1.b32.cont [3/12] (short) %v196_v4, 128  ;;  %217 = vxpose.xlu0.b32.cont [3/12] (short) %v195_v5, 128 }
  0x3c   : > { %250 = vxpose.xlu1.b32.cont [4/12] (short) %v198_v6, 128  ;;  %218 = vxpose.xlu0.b32.cont [4/12] (short) %v197_v7, 128 }
  0x40   : > { %251 = vxpose.xlu1.b32.cont [5/12] (short) %v200_v8, 128  ;;  %219 = vxpose.xlu0.b32.cont [5/12] (short) %v199_v9, 128 }
  0x44   : > { %252 = vxpose.xlu1.b32.cont [6/12] (short) %v202_v10, 128  ;;  %220 = vxpose.xlu0.b32.cont [6/12] (short) %v201_v11, 128 }
  0x48   : > { %253 = vxpose.xlu1.b32.cont [7/12] (short) %v204_v12, 128  ;;  %221 = vxpose.xlu0.b32.cont [7/12] (short) %v203_v13, 128 }
  0x4c   : > { %254 = vxpose.xlu1.b32.cont [8/12] (short) %v206_v14, 128  ;;  %222 = vxpose.xlu0.b32.cont [8/12] (short) %v205_v15, 128 }
  0x50   : > { %255 = vxpose.xlu1.b32.cont [9/12] (short) %v208_v16, 128  ;;  %223 = vxpose.xlu0.b32.cont [9/12] (short) %v207_v17, 128 }
  0x54   : > { %256 = vxpose.xlu1.b32.cont [10/12] (short) %v210_v18, 128  ;;  %224 = vxpose.xlu0.b32.cont [10/12] (short) %v209_v19, 128 }
  0x58   : > { %257 = vxpose.xlu1.b32.cont [11/12] (short) %v212_v20, 128  ;;  %225 = vxpose.xlu0.b32.cont [11/12] (short) %v211_v21, 128 }
  0x5c   : > { %258 = vxpose.xlu1.b32.end [12/12] (short) %v214_v22, 128  ;;  %226 = vxpose.xlu0.b32.end [12/12] (short) %v213_v23, 128 }
  0xac   : > { %v1191_v24 = vpop.trf.xlu1  ;;  %v1193_v25 = vpop.trf.xlu0 }
  0xad   : > { %v280_v26 = vsel %vm279_vm0, %v1193_v25, 0.0  ;;  %v328_v27 = vsel %vm279_vm0, %v1191_v24, 0.0 }
  0xae   : > { %281 = vadd.xlane.f32.xlu0 %v280_v26 }
  0xb0   : > { %v1199_v28 = vpop.trf.xlu1  ;;  %v1201_v29 = vpop.trf.xlu0 }
  0xb1   : > { %v283_v30 = vsel %vm279_vm0, %v1201_v29, 0.0  ;;  %v331_v31 = vsel %vm279_vm0, %v1199_v28, 0.0 }
  0xb2   : > { %329 = vadd.xlane.f32.xlu0 %v328_v27  ;;  %284 = vadd.xlane.f32.xlu1 %v283_v30 }
  0xb4   : > { %v1207_v32 = vpop.trf.xlu1  ;;  %v1209_v33 = vpop.trf.xlu0 }
  0xb5   : > { %v334_v34 = vsel %vm279_vm0, %v1207_v32, 0.0  ;;  %v286_v35 = vsel %vm279_vm0, %v1209_v33, 0.0 }
  0xb6   : > { %335 = vadd.xlane.f32.xlu0 %v334_v34  ;;  %332 = vadd.xlane.f32.xlu1 %v331_v31 }
  0xb8   : > { %v1215_v36 = vpop.trf.xlu0  ;;  %v1217_v37 = vpop.trf.xlu1 }
  0xb9   : > { %v289_v38 = vsel %vm279_vm0, %v1215_v36, 0.0  ;;  %v337_v42 = vsel %vm279_vm0, %v1217_v37, 0.0 }
  0xba   : > { %287 = vadd.xlane.f32.xlu1 %v286_v35 }
  0xbc   : > { %v1221_v39 = vpop.trf.xlu0  ;;  %v1223_v40 = vpop.trf.xlu1 }
  0xbd   : > { %v292_v41 = vsel %vm279_vm0, %v1221_v39, 0.0  ;;  %v340_v43 = vsel %vm279_vm0, %v1223_v40, 0.0 }
  0xbe   : > { %290 = vadd.xlane.f32.xlu1 %v289_v38  ;;  %293 = vadd.xlane.f32.xlu0 %v292_v41 }
  0xc0   : > { %v1231_v44 = vpop.trf.xlu0  ;;  %v1233_v45 = vpop.trf.xlu1 }
  0xc1   : > { %v295_v46 = vsel %vm279_vm0, %v1231_v44, 0.0  ;;  %v343_v50 = vsel %vm279_vm0, %v1233_v45, 0.0 }
  0xc2   : > { %338 = vadd.xlane.f32.xlu1 %v337_v42  ;;  %341 = vadd.xlane.f32.xlu0 %v340_v43 }
  0xc4   : > { %v1237_v47 = vpop.trf.xlu0  ;;  %v1239_v48 = vpop.trf.xlu1 }
  0xc5   : > { %v298_v49 = vsel %vm279_vm0, %v1237_v47, 0.0  ;;  %v346_v51 = vsel %vm279_vm0, %v1239_v48, 0.0 }
  0xc6   : > { %296 = vadd.xlane.f32.xlu1 %v295_v46  ;;  %299 = vadd.xlane.f32.xlu0 %v298_v49 }
  0xc8   : > { %v1247_v52 = vpop.trf.xlu0  ;;  %v1249_v53 = vpop.trf.xlu1 }
  0xc9   : > { %v301_v54 = vsel %vm279_vm0, %v1247_v52, 0.0  ;;  %v349_v58 = vsel %vm279_vm0, %v1249_v53, 0.0 }
  0xca   : > { %344 = vadd.xlane.f32.xlu1 %v343_v50  ;;  %347 = vadd.xlane.f32.xlu0 %v346_v51 }
  0xcc   : > { %v1253_v55 = vpop.trf.xlu0  ;;  %v1255_v56 = vpop.trf.xlu1 }
  0xcd   : > { %v304_v57 = vsel %vm279_vm0, %v1253_v55, 0.0  ;;  %v352_v59 = vsel %vm279_vm0, %v1255_v56, 0.0 }
  0xce   : > { %302 = vadd.xlane.f32.xlu1 %v301_v54  ;;  %305 = vadd.xlane.f32.xlu0 %v304_v57 }
  0xd0   : > { %v1263_v60 = vpop.trf.xlu0  ;;  %v1265_v61 = vpop.trf.xlu1 }
  0xd1   : > { %v307_v62 = vsel %vm279_vm0, %v1263_v60, 0.0  ;;  %v355_v2 = vsel %vm279_vm0, %v1265_v61, 0.0 }
  0xd2   : > { %350 = vadd.xlane.f32.xlu1 %v349_v58  ;;  %353 = vadd.xlane.f32.xlu0 %v352_v59 }
  0xd4   : > { %v1269_v63 = vpop.trf.xlu0  ;;  %v1271_v0 = vpop.trf.xlu1 }
  0xd5   : > { %v310_v1 = vsel %vm279_vm0, %v1269_v63, 0.0  ;;  %v358_v3 = vsel %vm279_vm0, %v1271_v0, 0.0 }
  0xd6   : > { %308 = vadd.xlane.f32.xlu1 %v307_v62  ;;  %311 = vadd.xlane.f32.xlu0 %v310_v1 }
  0xd8   : > { %v1279_v4 = vpop.trf.xlu0  ;;  %v1281_v5 = vpop.trf.xlu1 }
  0xd9   : > { %v313_v6 = vsel %vm279_vm0, %v1279_v4, 0.0  ;;  %v361_v10 = vsel %vm279_vm0, %v1281_v5, 0.0 }
  0xda   : > { %356 = vadd.xlane.f32.xlu1 %v355_v2  ;;  %359 = vadd.xlane.f32.xlu0 %v358_v3 }
  0xdc   : > { %v1285_v7 = vpop.trf.xlu0  ;;  %v1287_v8 = vpop.trf.xlu1 }
  0xdd   : > { %v316_v9 = vsel %vm279_vm0, %v1285_v7, 0.0  ;;  %v364_v11 = vsel %vm279_vm0, %v1287_v8, 0.0 }
  0xde   : > { %314 = vadd.xlane.f32.xlu1 %v313_v6  ;;  %317 = vadd.xlane.f32.xlu0 %v316_v9 }
  0xe0   : > { %v1295_v12 = vpop.trf.xlu0  ;;  %v1297_v13 = vpop.trf.xlu1 }
  0xe1   : > { %v319_v14 = vsel %vm279_vm0, %v1295_v12, 0.0  ;;  %v367_v18 = vsel %vm279_vm0, %v1297_v13, 0.0 }
  0xe2   : > { %362 = vadd.xlane.f32.xlu1 %v361_v10  ;;  %365 = vadd.xlane.f32.xlu0 %v364_v11 }
  0xe4   : > { %v1301_v15 = vpop.trf.xlu0  ;;  %v1303_v16 = vpop.trf.xlu1 }
  0xe5   : > { %v322_v17 = vsel %vm279_vm0, %v1301_v15, 0.0  ;;  %v370_v19 = vsel %vm279_vm0, %v1303_v16, 0.0 }
  0xe6   : > { %320 = vadd.xlane.f32.xlu1 %v319_v14  ;;  %323 = vadd.xlane.f32.xlu0 %v322_v17 }
  0xe8   : > { %v1311_v20 = vpop.trf.xlu0  ;;  %v1315_v22 = vpop.trf.xlu1 }
  0xe9   : > { %v325_v21 = vsel %vm279_vm0, %v1311_v20, 0.0  ;;  %v373_v23 = vsel %vm279_vm0, %v1315_v22, 0.0 }
  0xea   : > { %368 = vadd.xlane.f32.xlu1 %v367_v18  ;;  %371 = vadd.xlane.f32.xlu0 %v370_v19 }
  0xee   : > { %326 = vadd.xlane.f32.xlu1 %v325_v21 }
  0xf2   : > { %374 = vadd.xlane.f32.xlu1 %v373_v23 }
 0x137   : > { %v282_v26 = vpop.xlane.xlu0 %281 }
 0x138   : > { %v377_v27 = vmul.f32 0.010416667, %v282_v26 }
 0x13a   : > { %v1320_v30 = vsub.f32 %v1193_v25, %v377_v27 }
 0x13b   : > { %v285_v31 = vpop.xlane.xlu1 %284  ;;  %v330_v34 = vpop.xlane.xlu0 %329 }
 0x13c   : > { %v378_v35 = vmul.f32 0.010416667, %v285_v31  ;;  %v393_v38 = vmul.f32 0.010416667, %v330_v34  ;;  %v441_v41 = vmul.f32 %v1320_v30, %v1320_v30 }
 0x13e   : > { %v1325_v42 = vsub.f32 %v1201_v29, %v378_v35  ;;  %v1328_v43 = vsub.f32 %v1191_v24, %v393_v38  ;;  %v473_v46 = vsel %vm279_vm0, %v441_v41, 0.0 }
 0x13f   : > { %v333_v49 = vpop.xlane.xlu1 %332  ;;  %474 = vadd.xlane.f32.xlu0 %v473_v46  ;;  %v336_v50 = vpop.xlane.xlu0 %335 }
 0x140   : > { %v394_v25 = vmul.f32 0.010416667, %v333_v49  ;;  %v442_v51 = vmul.f32 %v1325_v42, %v1325_v42  ;;  %v457_v54 = vmul.f32 %v1328_v43, %v1328_v43  ;;  %v395_v57 = vmul.f32 0.010416667, %v336_v50 }
 0x142   : > { %v1336_v58 = vsub.f32 %v1199_v28, %v394_v25  ;;  %v476_v29 = vsel %vm279_vm0, %v442_v51, 0.0  ;;  %v521_v24 = vsel %vm279_vm0, %v457_v54, 0.0  ;;  %v1343_v2 = vsub.f32 %v1207_v32, %v395_v57 }
 0x143   : > { %v288_v59 = vpop.xlane.xlu1 %287  ;;  %477 = vadd.xlane.f32.xlu1 %v476_v29  ;;  %522 = vadd.xlane.f32.xlu0 %v521_v24 }
 0x144   : > { %v379_v62 = vmul.f32 0.010416667, %v288_v59  ;;  %v458_v1 = vmul.f32 %v1336_v58, %v1336_v58  ;;  %v459_v17 = vmul.f32 %v1343_v2, %v1343_v2 }
 0x146   : > { %v1346_v3 = vsub.f32 %v1209_v33, %v379_v62  ;;  %v524_v28 = vsel %vm279_vm0, %v458_v1, 0.0  ;;  %v527_v31 = vsel %vm279_vm0, %v459_v17, 0.0 }
 0x147   : > { %v291_v6 = vpop.xlane.xlu1 %290  ;;  %525 = vadd.xlane.f32.xlu1 %v524_v28  ;;  %v294_v9 = vpop.xlane.xlu0 %293 }
 0x148   : > { %v380_v10 = vmul.f32 0.010416667, %v291_v6  ;;  %v381_v11 = vmul.f32 0.010416667, %v294_v9  ;;  %v443_v14 = vmul.f32 %v1346_v3, %v1346_v3 }
 0x14a   : > { %v1354_v18 = vsub.f32 %v1215_v36, %v380_v10  ;;  %v1357_v32 = vsub.f32 %v1221_v39, %v381_v11  ;;  %v479_v33 = vsel %vm279_vm0, %v443_v14, 0.0 }
 0x14b   : > { %v339_v19 = vpop.xlane.xlu1 %338  ;;  %480 = vadd.xlane.f32.xlu0 %v479_v33  ;;  %v342_v21 = vpop.xlane.xlu0 %341 }
 0x14c   : > { %v396_v23 = vmul.f32 0.010416667, %v339_v19  ;;  %v397_v26 = vmul.f32 0.010416667, %v342_v21  ;;  %v444_v27 = vmul.f32 %v1354_v18, %v1354_v18  ;;  %v445_v35 = vmul.f32 %v1357_v32, %v1357_v32 }
 0x14e   : > { %v1364_v34 = vsub.f32 %v1217_v37, %v396_v23  ;;  %v1367_v36 = vsub.f32 %v1223_v40, %v397_v26  ;;  %v482_v39 = vsel %vm279_vm0, %v444_v27, 0.0  ;;  %v485_v54 = vsel %vm279_vm0, %v445_v35, 0.0 }
 0x14f   : > { %v297_v38 = vpop.xlane.xlu1 %296  ;;  %483 = vadd.xlane.f32.xlu1 %v482_v39  ;;  %528 = vadd.xlane.f32.xlu0 %v527_v31  ;;  %v300_v41 = vpop.xlane.xlu0 %299 }
 0x150   : > { %v382_v46 = vmul.f32 0.010416667, %v297_v38  ;;  %v383_v49 = vmul.f32 0.010416667, %v300_v41  ;;  %v460_v50 = vmul.f32 %v1364_v34, %v1364_v34  ;;  %v461_v37 = vmul.f32 %v1367_v36, %v1367_v36 }
 0x152   : > { %v1377_v40 = vsub.f32 %v1231_v44, %v382_v46  ;;  %v1380_v25 = vsub.f32 %v1237_v47, %v383_v49  ;;  %v530_v51 = vsel %vm279_vm0, %v460_v50, 0.0  ;;  %v533_v1 = vsel %vm279_vm0, %v461_v37, 0.0 }
 0x153   : > { %v345_v57 = vpop.xlane.xlu1 %344  ;;  %531 = vadd.xlane.f32.xlu1 %v530_v51  ;;  %486 = vadd.xlane.f32.xlu0 %v485_v54  ;;  %v348_v29 = vpop.xlane.xlu0 %347 }
 0x154   : > { %v398_v24 = vmul.f32 0.010416667, %v345_v57  ;;  %v399_v59 = vmul.f32 0.010416667, %v348_v29  ;;  %v446_v62 = vmul.f32 %v1377_v40, %v1377_v40  ;;  %v447_v6 = vmul.f32 %v1380_v25, %v1380_v25 }
 0x156   : > { %v1388_v44 = vsub.f32 %v1233_v45, %v398_v24  ;;  %v1391_v47 = vsub.f32 %v1239_v48, %v399_v59  ;;  %v488_v28 = vsel %vm279_vm0, %v446_v62, 0.0  ;;  %v491_v21 = vsel %vm279_vm0, %v447_v6, 0.0 }
 0x157   : > { %v303_v9 = vpop.xlane.xlu1 %302  ;;  %489 = vadd.xlane.f32.xlu1 %v488_v28  ;;  %534 = vadd.xlane.f32.xlu0 %v533_v1  ;;  %v306_v10 = vpop.xlane.xlu0 %305 }
 0x158   : > { %v384_v11 = vmul.f32 0.010416667, %v303_v9  ;;  %v385_v14 = vmul.f32 0.010416667, %v306_v10  ;;  %v462_v17 = vmul.f32 %v1388_v44, %v1388_v44  ;;  %v463_v45 = vmul.f32 %v1391_v47, %v1391_v47 }
 0x15a   : > { %v1401_v48 = vsub.f32 %v1247_v52, %v384_v11  ;;  %v1404_v33 = vsub.f32 %v1253_v55, %v385_v14  ;;  %v536_v19 = vsel %vm279_vm0, %v462_v17, 0.0  ;;  %v539_v35 = vsel %vm279_vm0, %v463_v45, 0.0 }
 0x15b   : > { %v351_v23 = vpop.xlane.xlu1 %350  ;;  %537 = vadd.xlane.f32.xlu1 %v536_v19  ;;  %492 = vadd.xlane.f32.xlu0 %v491_v21  ;;  %v354_v26 = vpop.xlane.xlu0 %353 }
 0x15c   : > { %v400_v27 = vmul.f32 0.010416667, %v351_v23  ;;  %v401_v31 = vmul.f32 0.010416667, %v354_v26  ;;  %v448_v39 = vmul.f32 %v1401_v48, %v1401_v48  ;;  %v449_v41 = vmul.f32 %v1404_v33, %v1404_v33 }
 0x15e   : > { %v1412_v52 = vsub.f32 %v1249_v53, %v400_v27  ;;  %v1415_v55 = vsub.f32 %v1255_v56, %v401_v31  ;;  %v494_v38 = vsel %vm279_vm0, %v448_v39, 0.0  ;;  %v497_v29 = vsel %vm279_vm0, %v449_v41, 0.0 }
 0x15f   : > { %v309_v46 = vpop.xlane.xlu1 %308  ;;  %495 = vadd.xlane.f32.xlu1 %v494_v38  ;;  %540 = vadd.xlane.f32.xlu0 %v539_v35  ;;  %v312_v49 = vpop.xlane.xlu0 %311 }
 0x160   : > { %v386_v50 = vmul.f32 0.010416667, %v309_v46  ;;  %v387_v37 = vmul.f32 0.010416667, %v312_v49  ;;  %v464_v51 = vmul.f32 %v1412_v52, %v1412_v52  ;;  %v465_v53 = vmul.f32 %v1415_v55, %v1415_v55 }
 0x162   : > { %v1425_v56 = vsub.f32 %v1263_v60, %v386_v50  ;;  %v1428_v54 = vsub.f32 %v1269_v63, %v387_v37  ;;  %v542_v57 = vsel %vm279_vm0, %v464_v51, 0.0  ;;  %v545_v6 = vsel %vm279_vm0, %v465_v53, 0.0 }
 0x163   : > { %v357_v24 = vpop.xlane.xlu1 %356  ;;  %543 = vadd.xlane.f32.xlu1 %v542_v57  ;;  %498 = vadd.xlane.f32.xlu0 %v497_v29  ;;  %v360_v59 = vpop.xlane.xlu0 %359 }
 0x164   : > { %v402_v62 = vmul.f32 0.010416667, %v357_v24  ;;  %v403_v1 = vmul.f32 0.010416667, %v360_v59  ;;  %v450_v28 = vmul.f32 %v1425_v56, %v1425_v56  ;;  %v451_v10 = vmul.f32 %v1428_v54, %v1428_v54 }
 0x166   : > { %v1436_v60 = vsub.f32 %v1265_v61, %v402_v62  ;;  %v1439_v63 = vsub.f32 %v1271_v0, %v403_v1  ;;  %v500_v9 = vsel %vm279_vm0, %v450_v28, 0.0  ;;  %v503_v26 = vsel %vm279_vm0, %v451_v10, 0.0 }
 0x167   : > { %v315_v11 = vpop.xlane.xlu1 %314  ;;  %501 = vadd.xlane.f32.xlu1 %v500_v9  ;;  %546 = vadd.xlane.f32.xlu0 %v545_v6  ;;  %v318_v14 = vpop.xlane.xlu0 %317 }
 0x168   : > { %v388_v17 = vmul.f32 0.010416667, %v315_v11  ;;  %v389_v45 = vmul.f32 0.010416667, %v318_v14  ;;  %v466_v19 = vmul.f32 %v1436_v60, %v1436_v60  ;;  %v467_v61 = vmul.f32 %v1439_v63, %v1439_v63 }
 0x16a   : > { %v1449_v0 = vsub.f32 %v1279_v4, %v388_v17  ;;  %v1452_v21 = vsub.f32 %v1285_v7, %v389_v45  ;;  %v548_v23 = vsel %vm279_vm0, %v466_v19, 0.0  ;;  %v551_v41 = vsel %vm279_vm0, %v467_v61, 0.0 }
 0x16b   : > { %v363_v27 = vpop.xlane.xlu1 %362  ;;  %549 = vadd.xlane.f32.xlu1 %v548_v23  ;;  %504 = vadd.xlane.f32.xlu0 %v503_v26  ;;  %v366_v31 = vpop.xlane.xlu0 %365 }
 0x16c   : > { %v404_v39 = vmul.f32 0.010416667, %v363_v27  ;;  %v405_v35 = vmul.f32 0.010416667, %v366_v31  ;;  %v452_v38 = vmul.f32 %v1449_v0, %v1449_v0  ;;  %v453_v49 = vmul.f32 %v1452_v21, %v1452_v21 }
 0x16e   : > { %v1460_v4 = vsub.f32 %v1281_v5, %v404_v39  ;;  %v1463_v7 = vsub.f32 %v1287_v8, %v405_v35  ;;  %v506_v46 = vsel %vm279_vm0, %v452_v38, 0.0  ;;  %v509_v59 = vsel %vm279_vm0, %v453_v49, 0.0 }
 0x16f   : > { %v321_v50 = vpop.xlane.xlu1 %320  ;;  %507 = vadd.xlane.f32.xlu1 %v506_v46  ;;  %552 = vadd.xlane.f32.xlu0 %v551_v41  ;;  %v324_v37 = vpop.xlane.xlu0 %323 }
 0x170   : > { %v390_v51 = vmul.f32 0.010416667, %v321_v50  ;;  %v391_v53 = vmul.f32 0.010416667, %v324_v37  ;;  %v468_v57 = vmul.f32 %v1460_v4, %v1460_v4  ;;  %v469_v5 = vmul.f32 %v1463_v7, %v1463_v7 }
 0x172   : > { %v1473_v8 = vsub.f32 %v1295_v12, %v390_v51  ;;  %v1476_v29 = vsub.f32 %v1301_v15, %v391_v53  ;;  %v554_v24 = vsel %vm279_vm0, %v468_v57, 0.0  ;;  %v557_v10 = vsel %vm279_vm0, %v469_v5, 0.0 }
 0x173   : > { %v369_v62 = vpop.xlane.xlu1 %368  ;;  %555 = vadd.xlane.f32.xlu1 %v554_v24  ;;  %510 = vadd.xlane.f32.xlu0 %v509_v59  ;;  %v372_v1 = vpop.xlane.xlu0 %371 }
 0x174   : > { %v406_v28 = vmul.f32 0.010416667, %v369_v62  ;;  %v407_v6 = vmul.f32 0.010416667, %v372_v1  ;;  %v454_v9 = vmul.f32 %v1473_v8, %v1473_v8  ;;  %v455_v14 = vmul.f32 %v1476_v29, %v1476_v29 }
 0x176   : > { %v1484_v12 = vsub.f32 %v1297_v13, %v406_v28  ;;  %v1487_v15 = vsub.f32 %v1303_v16, %v407_v6  ;;  %v512_v11 = vsel %vm279_vm0, %v454_v9, 0.0  ;;  %v515_v16 = vsel %vm279_vm0, %v455_v14, 0.0 }
 0x177   : > { %513 = vadd.xlane.f32.xlu1 %v512_v11  ;;  %v327_v17 = vpop.xlane.xlu1 %326  ;;  %558 = vadd.xlane.f32.xlu0 %v557_v10 }
 0x178   : > { %v392_v45 = vmul.f32 0.010416667, %v327_v17  ;;  %v470_v19 = vmul.f32 %v1484_v12, %v1484_v12  ;;  %v471_v23 = vmul.f32 %v1487_v15, %v1487_v15 }
 0x17a   : > { %v1495_v61 = vsub.f32 %v1311_v20, %v392_v45  ;;  %v560_v13 = vsel %vm279_vm0, %v470_v19, 0.0  ;;  %v563_v35 = vsel %vm279_vm0, %v471_v23, 0.0  ;;  %v1516_v45 = vld [vmem:[%s1702_s1] ss:$0 sm:$0xff] }
 0x17b   : > { %561 = vadd.xlane.f32.xlu1 %v560_v13  ;;  %v375_v26 = vpop.xlane.xlu1 %374  ;;  %516 = vadd.xlane.f32.xlu0 %v515_v16  ;;  %v1522_v23 = vld [vmem:[%s1703_s2] ss:$0 sm:$0xff] }
 0x17c   : > { %v408_v27 = vmul.f32 0.010416667, %v375_v26  ;;  %v456_v31 = vmul.f32 %v1495_v61, %v1495_v61 }
 0x17e   : > { %v1504_v39 = vsub.f32 %v1315_v22, %v408_v27  ;;  %v518_v20 = vsel %vm279_vm0, %v456_v31, 0.0 }
 0x17f   : > { %519 = vadd.xlane.f32.xlu1 %v518_v20  ;;  %564 = vadd.xlane.f32.xlu0 %v563_v35 }
 0x180   : > { %v472_v38 = vmul.f32 %v1504_v39, %v1504_v39 }
 0x182   : > { %v566_v41 = vsel %vm279_vm0, %v472_v38, 0.0 }
 0x183   : > { %567 = vadd.xlane.f32.xlu1 %v566_v41 }
 0x1c8   : > { %v475_v46 = vpop.xlane.xlu0 %474 }
 0x1c9   : > { %v569_v49 = vmul.f32 0.010416667, %v475_v46 }
 0x1cb   : > { %v601_v50 = vadd.f32 1e-05, %v569_v49 }
 0x1cc   : > { %v478_v37 = vpop.xlane.xlu1 %477  ;;  %v523_v22 = vpop.xlane.xlu0 %522 }
 0x1cd   : > { %931 = vrsqrt.f32 %v601_v50  ;;  %v570_v51 = vmul.f32 0.010416667, %v478_v37  ;;  %v585_v53 = vmul.f32 0.010416667, %v523_v22 }
 0x1cf   : > { %v602_v57 = vadd.f32 1e-05, %v570_v51  ;;  %v617_v5 = vadd.f32 1e-05, %v585_v53 }
 0x1d0   : > { %v526_v24 = vpop.xlane.xlu1 %525 }
 0x1d1   : > { %933 = vrsqrt.f32 %v602_v57  ;;  %v586_v59 = vmul.f32 0.010416667, %v526_v24 }
 0x1d2   : > { %935 = vrsqrt.f32 %v617_v5 }
 0x1d3   : > { %v618_v62 = vadd.f32 1e-05, %v586_v59 }
 0x1d4   : > { %v481_v1 = vpop.xlane.xlu0 %480 }
 0x1d5   : > { %937 = vrsqrt.f32 %v618_v62  ;;  %v571_v28 = vmul.f32 0.010416667, %v481_v1 }
 0x1d7   : > { %v603_v6 = vadd.f32 1e-05, %v571_v28 }
 0x1d8   : > { %v484_v9 = vpop.xlane.xlu1 %483  ;;  %v529_v10 = vpop.xlane.xlu0 %528 }
 0x1d9   : > { %939 = vrsqrt.f32 %v603_v6  ;;  %v572_v11 = vmul.f32 0.010416667, %v484_v9  ;;  %v587_v14 = vmul.f32 0.010416667, %v529_v10 }
 0x1da   : > { %v932_v17 = vpop.eup %931 }
 0x1db   : > { %v665_v19 = vmul.f32 %v932_v17, %v1320_v30  ;;  %v604_v13 = vadd.f32 1e-05, %v572_v11  ;;  %v619_v16 = vadd.f32 1e-05, %v587_v14 }
 0x1dc   : > { %v532_v26 = vpop.xlane.xlu1 %531  ;;  %v487_v27 = vpop.xlane.xlu0 %486 }
 0x1dd   : > { %v704_v31 = vmul.f32 %v1516_v45, %v665_v19  ;;  %941 = vrsqrt.f32 %v604_v13  ;;  %v588_v20 = vmul.f32 0.010416667, %v532_v26  ;;  %v573_v35 = vmul.f32 0.010416667, %v487_v27 }
 0x1de   : > { %v934_v38 = vpop.eup %933  ;;  %943 = vrsqrt.f32 %v619_v16 }
 0x1df   : > { %v936_v30 = vpop.eup %935  ;;  %v743_v41 = vadd.f32 %v1522_v23, %v704_v31  ;;  %v666_v46 = vmul.f32 %v934_v38, %v1325_v42  ;;  %v620_v49 = vadd.f32 1e-05, %v588_v20  ;;  %v605_v50 = vadd.f32 1e-05, %v573_v35 }
 0x1e0   : > { %v681_v37 = vmul.f32 %v936_v30, %v1328_v43  ;;  %v490_v22 = vpop.xlane.xlu1 %489  ;;  %v535_v51 = vpop.xlane.xlu0 %534 }
 0x1e1   : > { %775 = vst.msk [vmem:[%s1528_s16] sm:$0xff] %vm279_vm0, %v743_v41  ;;  %v705_v53 = vmul.f32 %v1516_v45, %v666_v46  ;;  %945 = vrsqrt.f32 %v620_v49  ;;  %v574_v57 = vmul.f32 0.010416667, %v490_v22  ;;  %v589_v5 = vmul.f32 0.010416667, %v535_v51 }
 0x1e2   : > { %v938_v24 = vpop.eup %937  ;;  %v720_v59 = vmul.f32 %v1516_v45, %v681_v37  ;;  %947 = vrsqrt.f32 %v605_v50 }
 0x1e3   : > { %v744_v42 = vadd.f32 %v1522_v23, %v705_v53  ;;  %v682_v62 = vmul.f32 %v938_v24, %v1336_v58  ;;  %v606_v43 = vadd.f32 1e-05, %v574_v57  ;;  %v621_v1 = vadd.f32 1e-05, %v589_v5 }
 0x1e4   : > { %v759_v28 = vadd.f32 %v1522_v23, %v720_v59  ;;  %v538_v6 = vpop.xlane.xlu1 %537  ;;  %v493_v9 = vpop.xlane.xlu0 %492 }
 0x1e5   : > { %776 = vst.msk [vmem:[%s1528_s16 + $0x8] sm:$0xff] %vm279_vm0, %v744_v42  ;;  %v721_v10 = vmul.f32 %v1516_v45, %v682_v62  ;;  %949 = vrsqrt.f32 %v606_v43  ;;  %v590_v11 = vmul.f32 0.010416667, %v538_v6  ;;  %v575_v14 = vmul.f32 0.010416667, %v493_v9 }
 0x1e6   : > { %v940_v17 = vpop.eup %939  ;;  %791 = vst.msk [vmem:[%s1528_s16 + $0x80] sm:$0xff] %vm279_vm0, %v759_v28  ;;  %951 = vrsqrt.f32 %v621_v1 }
 0x1e7   : > { %v760_v58 = vadd.f32 %v1522_v23, %v721_v10  ;;  %v667_v19 = vmul.f32 %v940_v17, %v1346_v3  ;;  %v622_v13 = vadd.f32 1e-05, %v590_v11  ;;  %v607_v16 = vadd.f32 1e-05, %v575_v14 }
 0x1e8   : > { %v496_v26 = vpop.xlane.xlu1 %495  ;;  %v541_v27 = vpop.xlane.xlu0 %540 }
 0x1e9   : > { %792 = vst.msk [vmem:[%s1528_s16 + $0x88] sm:$0xff] %vm279_vm0, %v760_v58  ;;  %v706_v31 = vmul.f32 %v1516_v45, %v667_v19  ;;  %953 = vrsqrt.f32 %v622_v13  ;;  %v576_v20 = vmul.f32 0.010416667, %v496_v26  ;;  %v591_v35 = vmul.f32 0.010416667, %v541_v27 }
 0x1ea   : > { %v942_v38 = vpop.eup %941  ;;  %955 = vrsqrt.f32 %v607_v16 }
 0x1eb   : > { %v944_v30 = vpop.eup %943  ;;  %v745_v41 = vadd.f32 %v1522_v23, %v706_v31  ;;  %v668_v46 = vmul.f32 %v942_v38, %v1354_v18  ;;  %v608_v3 = vadd.f32 1e-05, %v576_v20  ;;  %v623_v49 = vadd.f32 1e-05, %v591_v35 }
 0x1ec   : > { %v683_v50 = vmul.f32 %v944_v30, %v1343_v2  ;;  %v544_v37 = vpop.xlane.xlu1 %543  ;;  %v499_v22 = vpop.xlane.xlu0 %498 }
 0x1ed   : > { %777 = vst.msk [vmem:[%s1528_s16 + $0x10] sm:$0xff] %vm279_vm0, %v745_v41  ;;  %v707_v51 = vmul.f32 %v1516_v45, %v668_v46  ;;  %957 = vrsqrt.f32 %v608_v3  ;;  %v592_v53 = vmul.f32 0.010416667, %v544_v37  ;;  %v577_v57 = vmul.f32 0.010416667, %v499_v22 }
 0x1ee   : > { %v946_v5 = vpop.eup %945  ;;  %v722_v24 = vmul.f32 %v1516_v45, %v683_v50  ;;  %959 = vrsqrt.f32 %v623_v49 }
 0x1ef   : > { %v948_v18 = vpop.eup %947  ;;  %v746_v59 = vadd.f32 %v1522_v23, %v707_v51  ;;  %v684_v2 = vmul.f32 %v946_v5, %v1364_v34  ;;  %v624_v42 = vadd.f32 1e-05, %v592_v53  ;;  %v609_v62 = vadd.f32 1e-05, %v577_v57 }
 0x1f0   : > { %v761_v43 = vadd.f32 %v1522_v23, %v722_v24  ;;  %v669_v1 = vmul.f32 %v948_v18, %v1357_v32  ;;  %v502_v28 = vpop.xlane.xlu1 %501  ;;  %v547_v6 = vpop.xlane.xlu0 %546 }
 0x1f1   : > { %778 = vst.msk [vmem:[%s1528_s16 + $0x18] sm:$0xff] %vm279_vm0, %v746_v59  ;;  %v723_v9 = vmul.f32 %v1516_v45, %v684_v2  ;;  %961 = vrsqrt.f32 %v624_v42  ;;  %v578_v10 = vmul.f32 0.010416667, %v502_v28  ;;  %v593_v11 = vmul.f32 0.010416667, %v547_v6 }
 0x1f2   : > { %v950_v14 = vpop.eup %949  ;;  %793 = vst.msk [vmem:[%s1528_s16 + $0x90] sm:$0xff] %vm279_vm0, %v761_v43  ;;  %v708_v34 = vmul.f32 %v1516_v45, %v669_v1  ;;  %963 = vrsqrt.f32 %v609_v62 }
 0x1f3   : > { %v952_v17 = vpop.eup %951  ;;  %v762_v32 = vadd.f32 %v1522_v23, %v723_v9  ;;  %v670_v58 = vmul.f32 %v950_v14, %v1377_v40  ;;  %v610_v19 = vadd.f32 1e-05, %v578_v10  ;;  %v625_v13 = vadd.f32 1e-05, %v593_v11 }
 0x1f4   : > { %v747_v16 = vadd.f32 %v1522_v23, %v708_v34  ;;  %v685_v26 = vmul.f32 %v952_v17, %v1367_v36  ;;  %v550_v27 = vpop.xlane.xlu1 %549  ;;  %v505_v31 = vpop.xlane.xlu0 %504 }
 0x1f5   : > { %794 = vst.msk [vmem:[%s1528_s16 + $0x98] sm:$0xff] %vm279_vm0, %v762_v32  ;;  %v709_v20 = vmul.f32 %v1516_v45, %v670_v58  ;;  %965 = vrsqrt.f32 %v610_v19  ;;  %v594_v35 = vmul.f32 0.010416667, %v550_v27  ;;  %v579_v38 = vmul.f32 0.010416667, %v505_v31 }
 0x1f6   : > { %v954_v30 = vpop.eup %953  ;;  %779 = vst.msk [vmem:[%s1528_s16 + $0x20] sm:$0xff] %vm279_vm0, %v747_v16  ;;  %v724_v40 = vmul.f32 %v1516_v45, %v685_v26  ;;  %967 = vrsqrt.f32 %v625_v13 }
 0x1f7   : > { %v956_v41 = vpop.eup %955  ;;  %v748_v36 = vadd.f32 %v1522_v23, %v709_v20  ;;  %v686_v46 = vmul.f32 %v954_v30, %v1388_v44  ;;  %v626_v3 = vadd.f32 1e-05, %v594_v35  ;;  %v611_v49 = vadd.f32 1e-05, %v579_v38 }
 0x1f8   : > { %v763_v50 = vadd.f32 %v1522_v23, %v724_v40  ;;  %v671_v37 = vmul.f32 %v956_v41, %v1380_v25  ;;  %v508_v22 = vpop.xlane.xlu1 %507  ;;  %v553_v51 = vpop.xlane.xlu0 %552 }
 0x1f9   : > { %780 = vst.msk [vmem:[%s1528_s16 + $0x28] sm:$0xff] %vm279_vm0, %v748_v36  ;;  %v725_v53 = vmul.f32 %v1516_v45, %v686_v46  ;;  %969 = vrsqrt.f32 %v626_v3  ;;  %v580_v57 = vmul.f32 0.010416667, %v508_v22  ;;  %v595_v5 = vmul.f32 0.010416667, %v553_v51 }
 0x1fa   : > { %v958_v24 = vpop.eup %957  ;;  %795 = vst.msk [vmem:[%s1528_s16 + $0xa0] sm:$0xff] %vm279_vm0, %v763_v50  ;;  %v710_v44 = vmul.f32 %v1516_v45, %v671_v37  ;;  %971 = vrsqrt.f32 %v611_v49 }
 0x1fb   : > { %v960_v18 = vpop.eup %959  ;;  %v764_v25 = vadd.f32 %v1522_v23, %v725_v53  ;;  %v672_v59 = vmul.f32 %v958_v24, %v1401_v48  ;;  %v612_v2 = vadd.f32 1e-05, %v580_v57  ;;  %v627_v42 = vadd.f32 1e-05, %v595_v5 }
 0x1fc   : > { %v749_v62 = vadd.f32 %v1522_v23, %v710_v44  ;;  %v687_v43 = vmul.f32 %v960_v18, %v1391_v47  ;;  %v556_v1 = vpop.xlane.xlu1 %555  ;;  %v511_v28 = vpop.xlane.xlu0 %510 }
 0x1fd   : > { %796 = vst.msk [vmem:[%s1528_s16 + $0xa8] sm:$0xff] %vm279_vm0, %v764_v25  ;;  %v711_v6 = vmul.f32 %v1516_v45, %v672_v59  ;;  %973 = vrsqrt.f32 %v612_v2  ;;  %v596_v9 = vmul.f32 0.010416667, %v556_v1  ;;  %v581_v10 = vmul.f32 0.010416667, %v511_v28 }
 0x1fe   : > { %v962_v11 = vpop.eup %961  ;;  %781 = vst.msk [vmem:[%s1528_s16 + $0x30] sm:$0xff] %vm279_vm0, %v749_v62  ;;  %v726_v48 = vmul.f32 %v1516_v45, %v687_v43  ;;  %975 = vrsqrt.f32 %v627_v42 }
 0x1ff   : > { %v964_v14 = vpop.eup %963  ;;  %v750_v47 = vadd.f32 %v1522_v23, %v711_v6  ;;  %v688_v34 = vmul.f32 %v962_v11, %v1412_v52  ;;  %v628_v17 = vadd.f32 1e-05, %v596_v9  ;;  %v613_v32 = vadd.f32 1e-05, %v581_v10 }
 0x200   : > { %v765_v58 = vadd.f32 %v1522_v23, %v726_v48  ;;  %v673_v19 = vmul.f32 %v964_v14, %v1404_v33  ;;  %v514_v13 = vpop.xlane.xlu1 %513  ;;  %v559_v16 = vpop.xlane.xlu0 %558 }
 0x201   : > { %782 = vst.msk [vmem:[%s1528_s16 + $0x38] sm:$0xff] %vm279_vm0, %v750_v47  ;;  %v727_v26 = vmul.f32 %v1516_v45, %v688_v34  ;;  %977 = vrsqrt.f32 %v628_v17  ;;  %v582_v27 = vmul.f32 0.010416667, %v514_v13  ;;  %v597_v31 = vmul.f32 0.010416667, %v559_v16 }
 0x202   : > { %v966_v20 = vpop.eup %965  ;;  %797 = vst.msk [vmem:[%s1528_s16 + $0xb0] sm:$0xff] %vm279_vm0, %v765_v58  ;;  %v712_v52 = vmul.f32 %v1516_v45, %v673_v19  ;;  %979 = vrsqrt.f32 %v613_v32 }
 0x203   : > { %v968_v35 = vpop.eup %967  ;;  %v766_v33 = vadd.f32 %v1522_v23, %v727_v26  ;;  %v674_v38 = vmul.f32 %v966_v20, %v1425_v56  ;;  %v614_v30 = vadd.f32 1e-05, %v582_v27  ;;  %v629_v40 = vadd.f32 1e-05, %v597_v31 }
 0x204   : > { %v751_v41 = vadd.f32 %v1522_v23, %v712_v52  ;;  %v689_v36 = vmul.f32 %v968_v35, %v1415_v55  ;;  %v562_v46 = vpop.xlane.xlu1 %561  ;;  %v517_v3 = vpop.xlane.xlu0 %516 }
 0x205   : > { %798 = vst.msk [vmem:[%s1528_s16 + $0xb8] sm:$0xff] %vm279_vm0, %v766_v33  ;;  %v713_v49 = vmul.f32 %v1516_v45, %v674_v38  ;;  %981 = vrsqrt.f32 %v614_v30  ;;  %v598_v50 = vmul.f32 0.010416667, %v562_v46  ;;  %v583_v37 = vmul.f32 0.010416667, %v517_v3 }
 0x206   : > { %v970_v22 = vpop.eup %969  ;;  %783 = vst.msk [vmem:[%s1528_s16 + $0x40] sm:$0xff] %vm279_vm0, %v751_v41  ;;  %v728_v56 = vmul.f32 %v1516_v45, %v689_v36  ;;  %983 = vrsqrt.f32 %v629_v40 }
 0x207   : > { %v972_v51 = vpop.eup %971  ;;  %v752_v55 = vadd.f32 %v1522_v23, %v713_v49  ;;  %v690_v53 = vmul.f32 %v970_v22, %v1436_v60  ;;  %v630_v57 = vadd.f32 1e-05, %v598_v50  ;;  %v615_v5 = vadd.f32 1e-05, %v583_v37 }
 0x208   : > { %v767_v24 = vadd.f32 %v1522_v23, %v728_v56  ;;  %v675_v44 = vmul.f32 %v972_v51, %v1428_v54  ;;  %v520_v18 = vpop.xlane.xlu1 %519  ;;  %v565_v25 = vpop.xlane.xlu0 %564 }
 0x209   : > { %784 = vst.msk [vmem:[%s1528_s16 + $0x48] sm:$0xff] %vm279_vm0, %v752_v55  ;;  %v729_v59 = vmul.f32 %v1516_v45, %v690_v53  ;;  %985 = vrsqrt.f32 %v630_v57  ;;  %v584_v2 = vmul.f32 0.010416667, %v520_v18  ;;  %v599_v42 = vmul.f32 0.010416667, %v565_v25 }
 0x20a   : > { %v974_v62 = vpop.eup %973  ;;  %799 = vst.msk [vmem:[%s1528_s16 + $0xc0] sm:$0xff] %vm279_vm0, %v767_v24  ;;  %v714_v60 = vmul.f32 %v1516_v45, %v675_v44  ;;  %987 = vrsqrt.f32 %v615_v5 }
 0x20b   : > { %v976_v43 = vpop.eup %975  ;;  %v768_v54 = vadd.f32 %v1522_v23, %v729_v59  ;;  %v676_v1 = vmul.f32 %v974_v62, %v1449_v0  ;;  %v616_v28 = vadd.f32 1e-05, %v584_v2  ;;  %v631_v6 = vadd.f32 1e-05, %v599_v42 }
 0x20c   : > { %v753_v9 = vadd.f32 %v1522_v23, %v714_v60  ;;  %v691_v10 = vmul.f32 %v976_v43, %v1439_v63  ;;  %v568_v11 = vpop.xlane.xlu1 %567 }
 0x20d   : > { %800 = vst.msk [vmem:[%s1528_s16 + $0xc8] sm:$0xff] %vm279_vm0, %v768_v54  ;;  %v715_v48 = vmul.f32 %v1516_v45, %v676_v1  ;;  %989 = vrsqrt.f32 %v616_v28  ;;  %v600_v14 = vmul.f32 0.010416667, %v568_v11 }
 0x20e   : > { %v978_v47 = vpop.eup %977  ;;  %785 = vst.msk [vmem:[%s1528_s16 + $0x50] sm:$0xff] %vm279_vm0, %v753_v9  ;;  %v730_v0 = vmul.f32 %v1516_v45, %v691_v10  ;;  %991 = vrsqrt.f32 %v631_v6 }
 0x20f   : > { %v980_v34 = vpop.eup %979  ;;  %v754_v17 = vadd.f32 %v1522_v23, %v715_v48  ;;  %v692_v63 = vmul.f32 %v978_v47, %v1460_v4  ;;  %v632_v32 = vadd.f32 1e-05, %v600_v14 }
 0x210   : > { %v769_v58 = vadd.f32 %v1522_v23, %v730_v0  ;;  %v677_v19 = vmul.f32 %v980_v34, %v1452_v21 }
 0x211   : > { %786 = vst.msk [vmem:[%s1528_s16 + $0x58] sm:$0xff] %vm279_vm0, %v754_v17  ;;  %v731_v13 = vmul.f32 %v1516_v45, %v692_v63  ;;  %993 = vrsqrt.f32 %v632_v32 }
 0x212   : > { %v982_v16 = vpop.eup %981  ;;  %801 = vst.msk [vmem:[%s1528_s16 + $0xd0] sm:$0xff] %vm279_vm0, %v769_v58  ;;  %v716_v26 = vmul.f32 %v1516_v45, %v677_v19 }
 0x213   : > { %v984_v27 = vpop.eup %983  ;;  %v770_v4 = vadd.f32 %v1522_v23, %v731_v13  ;;  %v678_v31 = vmul.f32 %v982_v16, %v1473_v8 }
 0x214   : > { %v755_v20 = vadd.f32 %v1522_v23, %v716_v26  ;;  %v693_v21 = vmul.f32 %v984_v27, %v1463_v7 }
 0x215   : > { %802 = vst.msk [vmem:[%s1528_s16 + $0xd8] sm:$0xff] %vm279_vm0, %v770_v4  ;;  %v717_v52 = vmul.f32 %v1516_v45, %v678_v31 }
 0x216   : > { %v986_v35 = vpop.eup %985  ;;  %787 = vst.msk [vmem:[%s1528_s16 + $0x60] sm:$0xff] %vm279_vm0, %v755_v20  ;;  %v732_v33 = vmul.f32 %v1516_v45, %v693_v21 }
 0x217   : > { %v988_v38 = vpop.eup %987  ;;  %v756_v30 = vadd.f32 %v1522_v23, %v717_v52  ;;  %v694_v8 = vmul.f32 %v986_v35, %v1484_v12 }
 0x218   : > { %v771_v40 = vadd.f32 %v1522_v23, %v732_v33  ;;  %v679_v7 = vmul.f32 %v988_v38, %v1476_v29 }
 0x219   : > { %788 = vst.msk [vmem:[%s1528_s16 + $0x68] sm:$0xff] %vm279_vm0, %v756_v30  ;;  %v733_v41 = vmul.f32 %v1516_v45, %v694_v8 }
 0x21a   : > { %v990_v36 = vpop.eup %989  ;;  %803 = vst.msk [vmem:[%s1528_s16 + $0xe0] sm:$0xff] %vm279_vm0, %v771_v40  ;;  %v718_v46 = vmul.f32 %v1516_v45, %v679_v7 }
 0x21b   : > { %v992_v3 = vpop.eup %991  ;;  %v772_v49 = vadd.f32 %v1522_v23, %v733_v41  ;;  %v680_v12 = vmul.f32 %v990_v36, %v1495_v61 }
 0x21c   : > { %v757_v50 = vadd.f32 %v1522_v23, %v718_v46  ;;  %v695_v29 = vmul.f32 %v992_v3, %v1487_v15 }
 0x21d   : > { %804 = vst.msk [vmem:[%s1528_s16 + $0xe8] sm:$0xff] %vm279_vm0, %v772_v49  ;;  %v719_v37 = vmul.f32 %v1516_v45, %v680_v12 }
 0x21e   : > { %v994_v22 = vpop.eup %993  ;;  %789 = vst.msk [vmem:[%s1528_s16 + $0x70] sm:$0xff] %vm279_vm0, %v757_v50  ;;  %v734_v56 = vmul.f32 %v1516_v45, %v695_v29 }
 0x21f   : > { %v758_v51 = vadd.f32 %v1522_v23, %v719_v37  ;;  %v696_v55 = vmul.f32 %v994_v22, %v1504_v39 }
 0x220   : > { %v773_v53 = vadd.f32 %v1522_v23, %v734_v56 }
 0x221   : > { %790 = vst.msk [vmem:[%s1528_s16 + $0x78] sm:$0xff] %vm279_vm0, %v758_v51  ;;  %v735_v61 = vmul.f32 %v1516_v45, %v696_v55 }
 0x222   : > { %805 = vst.msk [vmem:[%s1528_s16 + $0xf0] sm:$0xff] %vm279_vm0, %v773_v53 }
 0x223   : > { %v774_v15 = vadd.f32 %v1522_v23, %v735_v61 }
 0x225   : > { %806 = vst.msk [vmem:[%s1528_s16 + $0xf8] sm:$0xff] %vm279_vm0, %v774_v15 }
 0x226 PF: > { %p13_p9 = scmp.ge.s32.totalorder %s1104_s17, 4   ;;  %s1710_s12 = smov %s1049_s13 }
 0x227   : > { %s1711_s13 = smov %s1053_s14  ;;  %s1712_s14 = smov %s1114_s20 }
 0x228   : > { %s1713_s15 = smov %s1104_s17  ;;  %15 = sbr.rel (!%p13_p9) target bundleno = 3 (0x3), region = 72 }
 0x22d   :  { %828 = vsyncpa [#allocation3], 1 }
 0x22e   :  { %830 = vsyncpa [#allocation3 + $0x1], 1 }

</bundles_post_ra>
